<compile_context>
chip_gen: v5e
topology: v5e:2x2
jax: 0.10.0
libtpu: 0.0.40
codegen_flags: <defaults>
</compile_context>

<pallas_src>
import functools

import jax
import jax.numpy as jnp
from jax.experimental import pallas as pl
from jax.experimental.pallas import tpu as pltpu

LANES = 128
SUBLANES = 8


# ---------------------------------------------------------------------------
# Charbonnier loss Pallas kernel: mean(sqrt((x - y)^2 + eps^2))
# ---------------------------------------------------------------------------
def _charbonnier_block_kernel(x_ref, y_ref, out_ref, *, eps, rows, block_rows,
                              chunk, n_chunks, ragged):
    """Partial sum of sqrt((x - y)^2 + eps^2) over one (block_rows, 128) tile.

    Writes an (8, 128) f32 vector partial (pure VPU adds; the single
    cross-lane reduction over all partials happens in the wrapper).
    """
    base = pl.program_id(0) * block_rows
    eps2 = jnp.float32(eps) * jnp.float32(eps)

    def chunk_body(j, acc):
        start = pl.multiple_of(j * chunk, chunk)
        xv = x_ref[pl.ds(start, chunk), :].astype(jnp.float32)  # upcast on load
        yv = y_ref[pl.ds(start, chunk), :].astype(jnp.float32)
        d = xv - yv
        v = jnp.sqrt(d * d + eps2)
        if ragged:
            # Only compiled in when rows % block_rows != 0: rows past the end
            # of the array hold unspecified data; select them to exact zero.
            row = base + start + jax.lax.broadcasted_iota(jnp.int32, v.shape, 0)
            v = jnp.where(row < rows, v, jnp.float32(0.0))
        # (chunk,128) -> (chunk//8, 8, 128), sum over leading axis: pure
        # vreg-to-vreg VPU adds into the (8,128) carry, no XLU.
        return acc + v.reshape(-1, SUBLANES, LANES).sum(axis=0)

    out_ref[...] = jax.lax.fori_loop(
        0, n_chunks, chunk_body, jnp.zeros((SUBLANES, LANES), jnp.float32))


def _sublane_packing(dtype):
    return max(1, 4 // jnp.dtype(dtype).itemsize)


def charbonnier_loss(x, y, eps=1e-3, target_tile_bytes=4 * 1024 * 1024,
                     chunk_rows=256):
    """mean(sqrt((x - y)^2 + eps^2)) over all elements; returns scalar f32."""
    assert x.shape == y.shape, (x.shape, y.shape)
    n = x.size
    eps = float(eps)
    eps2 = jnp.float32(eps) * jnp.float32(eps)

    xf = jnp.ravel(x)
    yf = jnp.ravel(y)

    # Alignment so each input's (rows, 128) view tiles into native vregs
    # (8 rows f32, 16 rows bf16, ...).
    sub_align = SUBLANES * max(_sublane_packing(x.dtype),
                               _sublane_packing(y.dtype))
    align = sub_align * LANES
    n_main = (n // align) * align          # kernel handles this aligned prefix
    n_tail = n - n_main                    # < one vreg tile, reduced in XLA

    def tail_sum(a, b):
        d = a.astype(jnp.float32) - b.astype(jnp.float32)
        return jnp.sum(jnp.sqrt(d * d + eps2))

    if n_main == 0:
        # Tiny input: nothing aligned to hand to the kernel.
        return tail_sum(xf, yf) / jnp.float32(n)

    rows = n_main // LANES                 # multiple of sub_align
    x2d = xf[:n_main].reshape(rows, LANES)  # lane-dense view, reshape is free
    y2d = yf[:n_main].reshape(rows, LANES)

    # Bytes-based tile: ~4 MiB per input tile (8192 rows f32, 16384 rows bf16)
    # keeps the ~0.35us per-grid-step overhead at a few % even on v7x HBM.
    max_itemsize = max(jnp.dtype(x.dtype).itemsize, jnp.dtype(y.dtype).itemsize)
    block_rows = max(sub_align,
                     min(target_tile_bytes // (LANES * max_itemsize), rows))
    chunk = max(sub_align, min(chunk_rows, block_rows) // sub_align * sub_align)
    block_rows = max(chunk, block_rows // chunk * chunk)
    n_chunks = block_rows // chunk
    n_blocks = pl.cdiv(rows, block_rows)
    ragged = (rows % block_rows) != 0

    kernel = functools.partial(
        _charbonnier_block_kernel,
        eps=eps, rows=rows, block_rows=block_rows,
        chunk=chunk, n_chunks=n_chunks, ragged=ragged)

    partials = pl.pallas_call(
        kernel,
        out_shape=jax.ShapeDtypeStruct((n_blocks * SUBLANES, LANES),
                                       jnp.float32),
        grid_spec=pltpu.PrefetchScalarGridSpec(
            num_scalar_prefetch=0,
            grid=(n_blocks,),
            in_specs=[
                pl.BlockSpec((block_rows, LANES), lambda i: (i, 0)),
                pl.BlockSpec((block_rows, LANES), lambda i: (i, 0)),
            ],
            out_specs=pl.BlockSpec((SUBLANES, LANES), lambda i: (i, 0)),
        ),
        compiler_params=pltpu.CompilerParams(
            # Fully independent grid steps -> Mosaic may shard across both
            # v7x TensorCores; equivalent sequential loop on 1-TC v5e/v6e.
            dimension_semantics=("parallel",),
            # 2 inputs x 2 buffers x ~4 MiB tile ~= 16 MiB; raise the scoped
            # VMEM limit above v5e's 16 MiB default (still < v7x's 64 MiB).
            vmem_limit_bytes=32 * 1024 * 1024,
        ),
    )(x2d, y2d)
    # TODO(synk): if per-step DMA bubbles remain visible on v7x, add
    # pipeline_mode=pl.Buffered(3) to the two input BlockSpecs.

    total = jnp.sum(partials)
    if n_tail:
        total = total + tail_sum(xf[n_main:], yf[n_main:])
    return total / jnp.float32(n)


# ---------------------------------------------------------------------------
# EdgeLoss: Laplacian-of-Gaussian pyramid diff + Charbonnier loss.
# TODO(synk): fuse the separable 5x5 replicate-padded depthwise Gaussian
# pyramid (shift-and-add via pltpu.roll / sublane-offset loads, ::2 down- and
# up-sample) with the Charbonnier accumulation into one streaming Pallas
# kernel; the XLA depthwise convs below dominate end-to-end HBM traffic.
# ---------------------------------------------------------------------------
def _conv_gauss(img):
    _, c, _, _ = img.shape
    k1d = jnp.array([0.05, 0.25, 0.4, 0.25, 0.05], dtype=jnp.float32)
    k2d = jnp.outer(k1d, k1d).astype(img.dtype)
    weight = jnp.broadcast_to(k2d, (c, 1, 5, 5))          # OIHW, depthwise
    img_p = jnp.pad(img, ((0, 0), (0, 0), (2, 2), (2, 2)), mode="edge")
    return jax.lax.conv_general_dilated(
        img_p, weight, window_strides=(1, 1), padding="VALID",
        dimension_numbers=("NCHW", "OIHW", "NCHW"), feature_group_count=c)


def _laplacian_kernel(img):
    filtered = _conv_gauss(img)
    down = filtered[:, :, ::2, ::2]
    new_filter = jnp.zeros_like(filtered)
    new_filter = new_filter.at[:, :, ::2, ::2].set(down * 4.0)
    filtered = _conv_gauss(new_filter)
    return img - filtered


def edge_loss(x, y, eps=1e-3):
    # (Optionally cast the Laplacians to bf16 here to halve the Charbonnier
    # stage's HBM reads; kept f32 to match the PyTorch reference exactly.)
    return charbonnier_loss(_laplacian_kernel(x), _laplacian_kernel(y), eps=eps)


if __name__ == "__main__":
    key = jax.random.PRNGKey(0)
    kx, ky = jax.random.split(key)
    # EdgeLoss hardcodes a 3-channel depthwise Gaussian kernel (NCHW inputs).
    x = jax.random.normal(kx, (2, 3, 16, 16), dtype=jnp.float32)
    y = jax.random.normal(ky, (2, 3, 16, 16), dtype=jnp.float32)

    loss_fn = jax.jit(edge_loss)
    loss = jax.block_until_ready(loss_fn(x, y))

    # Pure-JAX reference for the full EdgeLoss forward pass.
    lx, ly = _laplacian_kernel(x), _laplacian_kernel(y)
    ref = jnp.mean(jnp.sqrt((lx - ly) ** 2 + jnp.float32(1e-3) ** 2))
    assert jnp.allclose(loss, ref, rtol=1e-5, atol=1e-6), (loss, ref)

    print("KERNEL_OK")
</pallas_src>

<mosaic_0001>
module attributes {stable_mosaic.version = 11 : i64} {
  func.func @_charbonnier_block_kernel(%arg0: i32, %arg1: memref<8x128xf32, #tpu.memory_space<vmem>>, %arg2: memref<8x128xf32, #tpu.memory_space<vmem>>, %arg3: memref<8x128xf32, #tpu.memory_space<vmem>>) attributes {dimension_semantics = [#tpu.dimension_semantics<parallel>], iteration_bounds = array<i64: 1>, scalar_prefetch = 0 : i64, scratch_operands = 0 : i64, tpu.core_type = #tpu.core_type<tc>, window_params = [{transform_indices = @transform_0, window_bounds = array<i64: 8, 128>}, {transform_indices = @transform_1, window_bounds = array<i64: 8, 128>}, {transform_indices = @transform_2, window_bounds = array<i64: 8, 128>}]} {
    %cst = arith.constant 1.000000e-03 : f32
    %cst_0 = arith.constant 1.000000e-03 : f32
    %0 = arith.mulf %cst, %cst_0 : f32
    %cst_1 = arith.constant 0.000000e+00 : f32
    %1 = vector.broadcast %cst_1 : f32 to vector<8x128xf32>
    %c0_i32 = arith.constant 0 : i32
    %c8_i32 = arith.constant 8 : i32
    %2 = arith.muli %c0_i32, %c8_i32 : i32
    %3 = tpu.assume_multiple %2, 8 : i32
    %4 = arith.index_cast %3 : i32 to index
    %c0 = arith.constant 0 : index
    %5 = vector.load %arg1[%4, %c0] : memref<8x128xf32, #tpu.memory_space<vmem>>, vector<8x128xf32>
    %6 = arith.index_cast %3 : i32 to index
    %c0_2 = arith.constant 0 : index
    %7 = vector.load %arg2[%6, %c0_2] : memref<8x128xf32, #tpu.memory_space<vmem>>, vector<8x128xf32>
    %8 = arith.subf %5, %7 : vector<8x128xf32>
    %9 = arith.mulf %8, %8 : vector<8x128xf32>
    %10 = vector.broadcast %0 : f32 to vector<8x128xf32>
    %11 = arith.addf %9, %10 : vector<8x128xf32>
    %12 = math.sqrt %11 : vector<8x128xf32>
    %13 = vector.shape_cast %12 : vector<8x128xf32> to vector<1x8x128xf32>
    %cst_3 = arith.constant dense<0.000000e+00> : vector<8x128xf32>
    %14 = vector.multi_reduction <add>, %13, %cst_3 [0] : vector<1x8x128xf32> to vector<8x128xf32>
    %15 = arith.addf %1, %14 : vector<8x128xf32>
    %c1_i32 = arith.constant 1 : i32
    %c0_4 = arith.constant 0 : index
    %c0_5 = arith.constant 0 : index
    %16 = vector.load %arg3[%c0_4, %c0_5] : memref<8x128xf32, #tpu.memory_space<vmem>>, vector<8x128xf32>
    tpu.vector_store %arg3[%c0_4, %c0_5], %15 {strides = array<i32>} : memref<8x128xf32, #tpu.memory_space<vmem>>, vector<8x128xf32>,
    return
  }
  func.func @transform_0(%arg0: i32) -> (i32, i32) {
    %c0_i32 = arith.constant 0 : i32
    %c0_i32_0 = arith.constant 0 : i32
    return %arg0, %c0_i32 : i32, i32
  }
  func.func @transform_1(%arg0: i32) -> (i32, i32) {
    %c0_i32 = arith.constant 0 : i32
    %c0_i32_0 = arith.constant 0 : i32
    return %arg0, %c0_i32 : i32, i32
  }
  func.func @transform_2(%arg0: i32) -> (i32, i32) {
    %c0_i32 = arith.constant 0 : i32
    %c0_i32_0 = arith.constant 0 : i32
    return %arg0, %c0_i32 : i32, i32
  }
}

</mosaic_0001>

<bundles_post_ra>
// kernel: sub.4
= control target key start
LH: loop header
LB: loop body
LE: loop exit
PB: predicated region body
PF: predicated region fallthrough
CT: control target
= control target key end

     0   :  { %s276_s0 = inlined_call_operand.vmem [shape: f32[2,3,16,16], index: 0, kind: input, shape index: {}]   ;;  %s277_s1 = inlined_call_operand.vmem [shape: f32[2,3,16,16], index: 1, kind: input, shape index: {}]   ;;  %s278_s2 = inlined_call_operand.vmem [shape: f32[2,3,16,16], index: 2, kind: output, shape index: {}]  }
   0x1   :  { %v3_v0 = vld [vmem:[%s276_s0] sm:$0xff]  ;;  %v120_v2 = vld [vmem:[%s276_s0 + $0x30] sm:$0xff]  ;;  %v135_v18 = vld [vmem:[%s276_s0 + $0x8] sm:$0xff] }
   0x2   :  { %v4_v1 = vld [vmem:[%s277_s1] sm:$0xff]  ;;  %v121_v4 = vld [vmem:[%s277_s1 + $0x30] sm:$0xff]  ;;  %v136_v19 = vld [vmem:[%s277_s1 + $0x8] sm:$0xff] }
   0x3   :  { %v7_v3 = vsub.f32 %v3_v0, %v4_v1  ;;  %v123_v5 = vld [vmem:[%s276_s0 + $0x10] sm:$0xff]  ;;  %v16_v7 = vsub.f32 %v120_v2, %v121_v4  ;;  %v126_v9 = vld [vmem:[%s276_s0 + $0x40] sm:$0xff]  ;;  %v138_v20 = vld [vmem:[%s276_s0 + $0x38] sm:$0xff]  ;;  %v66_v21 = vsub.f32 %v135_v18, %v136_v19 }
   0x4   :  { %v124_v6 = vld [vmem:[%s277_s1 + $0x10] sm:$0xff]  ;;  %v127_v10 = vld [vmem:[%s277_s1 + $0x40] sm:$0xff]  ;;  %v139_v22 = vld [vmem:[%s277_s1 + $0x38] sm:$0xff] }
   0x5   :  { %v26_v8 = vsub.f32 %v123_v5, %v124_v6  ;;  %v129_v11 = vld [vmem:[%s276_s0 + $0x20] sm:$0xff]  ;;  %9 = vst [vmem:[%s278_s2] sm:$0xff] %v7_v3  ;;  %v36_v12 = vsub.f32 %v126_v9, %v127_v10  ;;  %v132_v14 = vld [vmem:[%s276_s0 + $0x50] sm:$0xff]  ;;  %v141_v23 = vld [vmem:[%s276_s0 + $0x18] sm:$0xff]  ;;  %v76_v25 = vsub.f32 %v138_v20, %v139_v22 }
   0x6   :  { %v130_v13 = vld [vmem:[%s277_s1 + $0x20] sm:$0xff]  ;;  %v133_v15 = vld [vmem:[%s277_s1 + $0x50] sm:$0xff]  ;;  %122 = vst [vmem:[%s278_s2 + $0x30] sm:$0xff] %v16_v7  ;;  %v142_v24 = vld [vmem:[%s277_s1 + $0x18] sm:$0xff] }
   0x7   :  { %v46_v16 = vsub.f32 %v129_v11, %v130_v13  ;;  %v56_v17 = vsub.f32 %v132_v14, %v133_v15  ;;  %125 = vst [vmem:[%s278_s2 + $0x10] sm:$0xff] %v26_v8  ;;  %v86_v26 = vsub.f32 %v141_v23, %v142_v24  ;;  %v144_v27 = vld [vmem:[%s276_s0 + $0x48] sm:$0xff]  ;;  %v150_v32 = vld [vmem:[%s276_s0 + $0x58] sm:$0xff] }
   0x8   :  { %128 = vst [vmem:[%s278_s2 + $0x40] sm:$0xff] %v36_v12  ;;  %v145_v28 = vld [vmem:[%s277_s1 + $0x48] sm:$0xff]  ;;  %v151_v33 = vld [vmem:[%s277_s1 + $0x58] sm:$0xff] }
   0x9   :  { %v147_v29 = vld [vmem:[%s276_s0 + $0x28] sm:$0xff]  ;;  %131 = vst [vmem:[%s278_s2 + $0x20] sm:$0xff] %v46_v16  ;;  %v96_v30 = vsub.f32 %v144_v27, %v145_v28  ;;  %v116_v35 = vsub.f32 %v150_v32, %v151_v33 }
   0xa   :  { %v148_v31 = vld [vmem:[%s277_s1 + $0x28] sm:$0xff]  ;;  %134 = vst [vmem:[%s278_s2 + $0x50] sm:$0xff] %v56_v17 }
   0xb   :  { %v106_v34 = vsub.f32 %v147_v29, %v148_v31  ;;  %137 = vst [vmem:[%s278_s2 + $0x8] sm:$0xff] %v66_v21 }
   0xc   :  { %140 = vst [vmem:[%s278_s2 + $0x38] sm:$0xff] %v76_v25 }
   0xd   :  { %143 = vst [vmem:[%s278_s2 + $0x18] sm:$0xff] %v86_v26 }
   0xe   :  { %146 = vst [vmem:[%s278_s2 + $0x48] sm:$0xff] %v96_v30 }
   0xf   :  { %149 = vst [vmem:[%s278_s2 + $0x28] sm:$0xff] %v106_v34 }
  0x10   :  { %152 = vst [vmem:[%s278_s2 + $0x58] sm:$0xff] %v116_v35 }

// kernel: edge_loss.1
= control target key start
LH: loop header
LB: loop body
LE: loop exit
PB: predicated region body
PF: predicated region fallthrough
CT: control target
= control target key end

     0   :  { %s61_s0 = inlined_call_operand.vmem [shape: f32[8,128], index: 0, kind: input, shape index: {}]   ;;  %s62_s1 = inlined_call_operand.vmem [shape: f32[8,128], index: 1, kind: input, shape index: {}]   ;;  %s63_s2 = inlined_call_operand.vmem [shape: f32[8,128], index: 2, kind: output, shape index: {}]  }
   0x1   :  { %v11_v0 = vld [vmem:[%s61_s0] sm:$0xff] }
   0x2   :  { %v12_v1 = vld [vmem:[%s62_s1] sm:$0xff] }
   0x3   :  { %v13_v2 = vsub.f32 %v11_v0, %v12_v1 }
   0x5   :  { %v14_v3 = vmul.f32 %v13_v2, %v13_v2 }
   0x7   :  { %v15_v4 = vadd.f32 1.0000001e-06, %v14_v3 }
   0x9   :  { %35 = vrsqrt.f32 %v15_v4  ;;  %vm23_vm0 = vcmp.eq.f32.partialorder %v15_v4, inf  ;;  %v26_v11 = vand.u32 2147483648, %v15_v4  ;;  %vm25_vm1 = vcmp.eq.f32.partialorder %v15_v4, 0.0 }
   0xf   :  { %v36_v5 = vpop.eup %35 }
  0x10   :  { %v17_v6 = vmul.f32 %v36_v5, %v15_v4 }
  0x12   :  { %v18_v7 = vmul.f32 %v36_v5, %v17_v6 }
  0x14   :  { %v19_v8 = vmul.f32 0.5, %v18_v7 }
  0x16   :  { %v20_v9 = vsub.f32 1.5, %v19_v8 }
  0x18   :  { %v21_v10 = vmul.f32 %v36_v5, %v20_v9 }
  0x1a   :  { %v22_v12 = vmul.f32 %v21_v10, %v15_v4 }
  0x1c   :  { %v24_v13 = vsel %vm23_vm0, %v15_v4, %v22_v12 }
  0x1d   :  { %v27_v14 = vsel %vm25_vm1, %v26_v11, %v24_v13 }
  0x1e   :  { %30 = vst [vmem:[%s63_s2] sm:$0xff] %v27_v14 }

</bundles_post_ra>
